<compile_context>
chip_gen: v7x
topology: tpu7x:2x2x1
jax: 0.10.0
libtpu: 0.0.40
codegen_flags: <defaults>
</compile_context>

<pallas_src>
import jax
import jax.numpy as jnp
from jax.experimental import pallas as pl
from jax.experimental.pallas import tpu as pltpu


# ---------------------------------------------------------------------------
# Vocab construction (mirrors deepnog.data.dataset.gen_amino_acid_vocab)
# ---------------------------------------------------------------------------
def gen_amino_acid_vocab(alphabet: str = "ACDEFGHIKLMNPQRSTVWYBZJUOX"):
    """Both upper- and lower-case letters map to the same 1-based index
    (index 0 is reserved for padding), so len(vocab) == 2 * len(alphabet)."""
    vocab = {}
    for i, aa in enumerate(alphabet):
        vocab[aa.upper()] = i + 1
        vocab[aa.lower()] = i + 1
    return vocab


def _round_up(x: int, m: int) -> int:
    return ((x + m - 1) // m) * m


# ---------------------------------------------------------------------------
# Pallas kernel: embedding gather as a one-hot matmul, output already (T, D)
# ---------------------------------------------------------------------------
def _embedding_kernel(idx_ref, emb_ref, out_ref):
    """idx_ref: (T, 1) int32   -- token ids for this tile (tokens on sublanes)
       emb_ref: (V, D) float32 -- embedding table (resident in VMEM, 1 DMA)
       out_ref: (T, D) float32 -- output tile in final layout (no transpose)"""
    idx = idx_ref[...]                                     # (T, 1) int32
    emb = emb_ref[...]                                     # (V, D) float32
    V = emb.shape[0]

    # Tiny (1, V) lane iota; the == broadcast expands it to (T, V).
    iota_v = jax.lax.broadcasted_iota(jnp.int32, (1, V), 1)
    onehot = (idx == iota_v).astype(emb.dtype)             # (T, V)

    # (T, V) @ (V, D) on the MXU; exact selection (one nonzero per row).
    out_ref[...] = jnp.dot(onehot, emb,
                           preferred_element_type=jnp.float32).astype(out_ref.dtype)


def amino_acid_word_embedding(sequence, emb_table, tile_tokens: int = 8192):
    """sequence: (B, L) integer array; emb_table: (V, D) float32.
    Returns (B, L, D) float32, identical to nn.Embedding()(sequence.long())."""
    B, L = sequence.shape
    V, D = emb_table.shape
    N = B * L

    # Tokens flattened onto the sublane axis.  Pad only to a multiple of 8
    # (sublane granularity).  The last grid block may be partial; Pallas drops
    # the out-of-bounds writes, so no O(N) slice of the output is needed when
    # N is not a multiple of the tile.
    N8 = _round_up(N, 8)
    T = min(_round_up(tile_tokens, 128), N8)       # multiple of 8, <= N8
    num_tiles = pl.cdiv(N8, T)
    N_idx = num_tiles * T                          # index array fully covers grid

    idx = sequence.astype(jnp.int32).reshape(-1)
    if N_idx != N:
        idx = jnp.pad(idx, (0, N_idx - N))         # pad with index 0 (cheap, int32)
    idx2d = idx.reshape(N_idx, 1)

    out = pl.pallas_call(
        _embedding_kernel,
        out_shape=jax.ShapeDtypeStruct((N8, D), emb_table.dtype),
        grid=(num_tiles,),
        in_specs=[
            pl.BlockSpec((T, 1), lambda i: (i, 0)),   # token-id tile
            pl.BlockSpec((V, D), lambda i: (0, 0)),   # table: resident, one DMA
        ],
        out_specs=pl.BlockSpec((T, D), lambda i: (i, 0)),
        compiler_params=pltpu.CompilerParams(
            dimension_semantics=("parallel",),        # megacore sharding on v7x
            vmem_limit_bytes=48 * 1024 * 1024,        # covers lane-padded blocks
        ),                                            # on v5e's 16 MiB default
    )(idx2d, emb_table)

    if N8 != N:                                       # only when B*L % 8 != 0
        out = out[:N]
    return out.reshape(B, L, D)


# ---------------------------------------------------------------------------
# Driver
# ---------------------------------------------------------------------------
if __name__ == "__main__":
    embedding_dim = 10
    vocab = gen_amino_acid_vocab()
    num_embeddings = len(vocab) // 2 + 1          # 26 amino acids + padding idx -> 27

    key = jax.random.PRNGKey(0)
    k_emb, k_seq = jax.random.split(key)

    # nn.Embedding default weight init is N(0, 1).
    emb_table = jax.random.normal(k_emb, (num_embeddings, embedding_dim),
                                  dtype=jnp.float32)

    # Small batch of "translated" sequences: (batch=2, seq_len=16) integer codes.
    batch, seq_len = 2, 16
    sequence = jax.random.randint(k_seq, (batch, seq_len),
                                  minval=0, maxval=num_embeddings,
                                  dtype=jnp.int32)

    out = amino_acid_word_embedding(sequence, emb_table)
    out = jax.block_until_ready(out)

    # Pure-JAX reference (same semantics as nn.Embedding gather).
    ref = emb_table[sequence]
    assert out.shape == (batch, seq_len, embedding_dim)
    assert jnp.allclose(out, ref, atol=1e-6), "mismatch vs. reference gather"

    print("KERNEL_OK")
</pallas_src>

<mosaic_0001>
module attributes {stable_mosaic.version = 11 : i64} {
  func.func @_embedding_kernel(%arg0: i32, %arg1: memref<32x1xi32, #tpu.memory_space<vmem>>, %arg2: memref<27x10xf32, #tpu.memory_space<vmem>>, %arg3: memref<32x10xf32, #tpu.memory_space<vmem>>) attributes {dimension_semantics = [#tpu.dimension_semantics<parallel>], iteration_bounds = array<i64: 1>, scalar_prefetch = 0 : i64, scratch_operands = 0 : i64, tpu.core_type = #tpu.core_type<tc>, window_params = [{transform_indices = @transform_0, window_bounds = array<i64: 32, 1>}, {pipeline_mode = #tpu.pipeline_mode<synchronous>, transform_indices = @transform_1, window_bounds = array<i64: 27, 10>}, {transform_indices = @transform_2, window_bounds = array<i64: 32, 10>}]} {
    %c0 = arith.constant 0 : index
    %c0_0 = arith.constant 0 : index
    %0 = vector.load %arg1[%c0, %c0_0] : memref<32x1xi32, #tpu.memory_space<vmem>>, vector<32x1xi32>
    %c0_1 = arith.constant 0 : index
    %c0_2 = arith.constant 0 : index
    %1 = vector.load %arg2[%c0_1, %c0_2] : memref<27x10xf32, #tpu.memory_space<vmem>>, vector<27x10xf32>
    %2 = tpu.iota {dimensions = array<i32: 1>} : vector<1x27xi32>
    %3 = vector.broadcast %0 : vector<32x1xi32> to vector<32x27xi32>
    %4 = vector.broadcast %2 : vector<1x27xi32> to vector<32x27xi32>
    %5 = arith.cmpi eq, %3, %4 : vector<32x27xi32>
    %6 = arith.extui %5 : vector<32x27xi1> to vector<32x27xi32>
    %7 = arith.sitofp %6 : vector<32x27xi32> to vector<32x27xf32>
    %cst = arith.constant dense<0.000000e+00> : vector<32x10xf32>
    %8 = tpu.matmul %7, %1, %cst {dimension_numbers = #tpu.dot_dimension_numbers<[1], [0], [0], [1], [0, 0, 1, 1], [], []>} : vector<32x27xf32>, vector<27x10xf32>, vector<32x10xf32> -> vector<32x10xf32>
    %c0_3 = arith.constant 0 : index
    %c0_4 = arith.constant 0 : index
    %9 = vector.load %arg3[%c0_3, %c0_4] : memref<32x10xf32, #tpu.memory_space<vmem>>, vector<32x10xf32>
    tpu.vector_store %arg3[%c0_3, %c0_4], %8 {strides = array<i32>} : memref<32x10xf32, #tpu.memory_space<vmem>>, vector<32x10xf32>,
    return
  }
  func.func @transform_0(%arg0: i32) -> (i32, i32) {
    %c0_i32 = arith.constant 0 : i32
    %c0_i32_0 = arith.constant 0 : i32
    return %arg0, %c0_i32 : i32, i32
  }
  func.func @transform_1(%arg0: i32) -> (i32, i32) {
    %c0_i32 = arith.constant 0 : i32
    %c0_i32_0 = arith.constant 0 : i32
    %c0_i32_1 = arith.constant 0 : i32
    return %c0_i32, %c0_i32_0 : i32, i32
  }
  func.func @transform_2(%arg0: i32) -> (i32, i32) {
    %c0_i32 = arith.constant 0 : i32
    %c0_i32_0 = arith.constant 0 : i32
    return %arg0, %c0_i32 : i32, i32
  }
}

</mosaic_0001>

<bundles_post_ra>
// kernel: tpu_custom_call.1
= control target key start
LH: loop header
LB: loop body
LE: loop exit
PB: predicated region body
PF: predicated region fallthrough
CT: control target
= control target key end

     0   :  { %v206_v0 = vmov 0   ;;  %vm58_vm0 = vcmask 1042432   ;;  %vm207_vm1 = vmmov 1   ;;  %v19_v11 = vlaneseq  ;;  %s260_s0 = inlined_call_operand.vmem [shape: s32[32,1], index: 0, kind: input, shape index: {}]   ;;  %s261_s1 = inlined_call_operand.vmem [shape: f32[27,10], index: 1, kind: input, shape index: {}]   ;;  %s262_s2 = inlined_call_operand.vmem [shape: f32[32,10], index: 2, kind: output, shape index: {}]  }
   0x1   :  { %205 = vset.pattern.permute.xlu1 %v206_v0  ;;  %204 = vset.pattern.permute.xlu0 %v206_v0  ;;  %v12_v1 = vld [vmem:[%s260_s0 + $0x8] sm:$0xff]  ;;  %v11_v2 = vld [vmem:[%s260_s0] sm:$0xff]  ;;  %v14_v3 = vld [vmem:[%s260_s0 + $0x18] sm:$0xff]  ;;  %vm45_vm3 = vcmask 220160   ;;  %v208_v15 = vmov 0.0   ;;  %vm147_vm8 = vcmask 80896  }
   0x2   :  { %25 = vperm.xlu1 %205, %v12_v1   ;;  %22 = vperm.xlu0 %204, %v11_v2   ;;  %v15_v4 = vld [vmem:[%s261_s1] sm:$0xff]  ;;  %v16_v5 = vld [vmem:[%s261_s1 + $0x8] sm:$0xff]  ;;  %v13_v6 = vld [vmem:[%s260_s0 + $0x10] sm:$0xff]  ;;  %v20_v12 = vand.u32 127, %v19_v11 }
   0x3   :  { %v187_v7 = vpack.c.bf16 %v16_v5, %v15_v4  ;;  %v17_v8 = vld [vmem:[%s261_s1 + $0x10] sm:$0xff]  ;;  %v18_v9 = vld [vmem:[%s261_s1 + $0x18] sm:$0x7]  ;;  %vm192_vm2 = vmpackc.low %vm58_vm0, %vm207_vm1 }
   0x4   :  { %v191_v10 = vpack.c.bf16 %v18_v9, %v17_v8 }
   0x5   :  { %188 = vmatprep.subr.bf16.mxu0 %v187_v7  ;;  %197 = vmatprep.subr.bf16.mxu1 %v187_v7 }
   0x6   :  { %31 = vperm.xlu1 %205, %v14_v3   ;;  %28 = vperm.xlu0 %204, %v13_v6  }
   0x7   :  { %190 = vmatpush3.bf16.msra.mxu0 %v187_v7  ;;  %199 = vmatpush3.bf16.msra.mxu1 %v187_v7 }
   0x8   :  { %193 = vmatprep.subr.msk.bf16.mxu0 %vm192_vm2, %v191_v10  ;;  %198 = vmatprep.subr.msk.bf16.mxu1 %vm192_vm2, %v191_v10 }
   0xb   :  { %196 = vmatpush3.bf16.msk.msra.mxu0 %vm192_vm2, %v191_v10  ;;  %200 = vmatpush3.bf16.msk.msra.mxu1 %vm192_vm2, %v191_v10 }
  0x81   :  { %v26_v13 = vpop.permute.xlu1 %25  ;;  %v23_v14 = vpop.permute.xlu0 %22 }
  0x82   :  { %vm34_vm4 = vcmp.eq.s32.totalorder %v26_v13, %v20_v12  ;;  %vm33_vm5 = vcmp.eq.s32.totalorder %v23_v14, %v20_v12 }
  0x83   :  { %v157_v16 = vsel %vm34_vm4, 1.0, %v208_v15  ;;  %v156_v17 = vsel %vm33_vm5, 1.0, %v208_v15 }
  0x84   :  { %181 = vmatprep.mubr.msk.f32.mxu0 %vm45_vm3, %v156_v17 }
  0x85   :  { %v32_v18 = vpop.permute.xlu1 %31  ;;  %182 = vmatmul.mubr.msk.f32.vlgmr.msra.gmra.mrb[0].mxu0 %vm45_vm3, %v157_v16  ;;  %v29_v19 = vpop.permute.xlu0 %28 }
  0x86   :  { %vm36_vm6 = vcmp.eq.s32.totalorder %v32_v18, %v20_v12  ;;  %vm35_vm7 = vcmp.eq.s32.totalorder %v29_v19, %v20_v12 }
  0x87   :  { %v159_v20 = vsel %vm36_vm6, 1.0, %v208_v15  ;;  %v158_v21 = vsel %vm35_vm7, 1.0, %v208_v15 }
  0x88   :  { %184 = vmatprep.mubr.msk.f32.mxu1 %vm45_vm3, %v158_v21 }
  0x89   :  { %185 = vmatmul.mubr.msk.f32.vlgmr.msra.gmra.mrb[0].mxu1 %vm45_vm3, %v159_v20 }
 0x158   :  { %v183_v22 = vpop.f32.mrb[0].mxu0 }
 0x159   :  { %149 = vst.msk [vmem:[%s262_s2 + $0x8] sm:$0xff] %vm147_vm8, %v183_v22  ;;  %v128_v23 = vpop.f32.mrb[1].mxu0 }
 0x15a   :  { %148 = vst.msk [vmem:[%s262_s2] sm:$0xff] %vm147_vm8, %v128_v23 }
 0x15c   :  { %v186_v24 = vpop.f32.mrb[0].mxu1 }
 0x15d   :  { %151 = vst.msk [vmem:[%s262_s2 + $0x18] sm:$0xff] %vm147_vm8, %v186_v24  ;;  %v138_v25 = vpop.f32.mrb[1].mxu1 }
 0x15e   :  { %150 = vst.msk [vmem:[%s262_s2 + $0x10] sm:$0xff] %vm147_vm8, %v138_v25 }

</bundles_post_ra>
